<compile_context>
chip_gen: v7x
topology: tpu7x:2x2x1
jax: 0.10.0
libtpu: 0.0.40
codegen_flags: <defaults>
</compile_context>

<pallas_src>
import functools

import jax
import jax.numpy as jnp
from jax import lax
from jax.experimental import pallas as pl
from jax.experimental.pallas import tpu as pltpu


def _perona_malik_kernel(halo_ref, img_ref, out_ref, *, w, th, inv_dr2, delta_t):
    # halo_ref : (1, 1, 2, Wp) -- rows just above / below this row tile
    #            (already reflected at the global top/bottom border).
    # img_ref  : (1, TH, Wp) row tile of the (padded) image.
    # out_ref  : (1, TH, Wp) updated row tile.
    x = img_ref[0].astype(jnp.float32)                  # (TH, Wp)
    halo = halo_ref[0, 0, :, :].astype(jnp.float32)     # (2, Wp)
    top = halo[0:1, :]                                   # row above the tile
    bot = halo[1:2, :]                                   # row below the tile

    wp = x.shape[1]
    row = lax.broadcasted_iota(jnp.int32, (th, wp), 0)
    col = lax.broadcasted_iota(jnp.int32, (th, wp), 1)

    # Vertical neighbour sum: XLU sublane rotations for interior rows, halo
    # rows for the tile edges (sum is invariant to rotation direction).
    ud = pltpu.roll(x, shift=1, axis=0) + pltpu.roll(x, shift=th - 1, axis=0)
    ud = jnp.where(row == 0, top + x[1:2, :], ud)
    ud = jnp.where(row == th - 1, bot + x[th - 2:th - 1, :], ud)

    # Horizontal neighbour sum: XLU lane rotations; ReflectionPad2d(1) at the
    # original (unpadded) column border makes both neighbours equal the inner
    # column, so the boundary fix is a single lane-broadcast select per side.
    lr = pltpu.roll(x, shift=1, axis=1) + pltpu.roll(x, shift=wp - 1, axis=1)
    lr = jnp.where(col == 0, 2.0 * x[:, 1:2], lr)
    lr = jnp.where(col == w - 1, 2.0 * x[:, w - 2:w - 1], lr)

    # 5-tap Laplacian (non-learnable make_operator('laplace'): zero corners).
    grad = ud + lr - 4.0 * x

    # 'exp' diffusion coefficient; divide pre-folded into inv_dr2 (EUP exp).
    coeff = jnp.exp(-(grad * grad) * inv_dr2)
    out = x + grad * coeff * delta_t
    out_ref[0] = jnp.clip(out, 0.0, 1.0).astype(out_ref.dtype)


def _round_up(x, m):
    return (x + m - 1) // m * m


def _pick_row_tile(Hp, Wp, N, itemsize, target_bytes=8 << 20, min_steps=4):
    """Largest multiple-of-8 divisor of Hp with tile <= target_bytes and
    (when achievable) at least `min_steps` total grid steps for megacore."""
    divisors = [d for d in range(8, Hp + 1, 8) if Hp % d == 0]
    max_rows = max(8, target_bytes // (Wp * itemsize))
    fitting = [d for d in divisors if d <= max_rows] or [8]
    parallel = [d for d in fitting if N * (Hp // d) >= min_steps]
    return max(parallel) if parallel else max(fitting)


def perona_malik_forward(image, diffusion_rate, delta_t, row_tile=None):
    """image: (N, 1, H, W) -> (N, 1, H, W); default 'exp' coefficient."""
    N, C, H, W = image.shape
    assert C == 1, "PeronaMalik operators are single-channel (1,1,3,3) kernels"
    assert H >= 2 and W >= 2, "ReflectionPad2d(1) needs H, W >= 2"
    dtype = image.dtype
    img = image.reshape(N, H, W)

    # Pad to TPU-friendly (8, 128) multiples; outputs are sliced back.
    Hp = _round_up(H, 8)
    Wp = _round_up(W, 128)
    if Hp != H or Wp != W:
        img_p = jnp.pad(img, ((0, 0), (0, Hp - H), (0, Wp - W)))
        if Hp != H:
            # First padded row must hold the reflection of the row below the
            # image (row H-2) so row H-1 sees the correct 'down' neighbour.
            img_p = img_p.at[:, H, :W].set(img[:, H - 2, :])
    else:
        img_p = img

    TH = (_pick_row_tile(Hp, Wp, N, jnp.dtype(dtype).itemsize)
          if row_tile is None else row_tile)
    assert Hp % TH == 0 and TH % 8 == 0
    nt = Hp // TH

    # Halo rows for every tile: the row just above / below, reflected at the
    # global border (matches ReflectionPad2d(1)).  Tiny: 2 rows per tile.
    # TODO(synk): could move this onto the kernel's DMA pipeline with
    # PrefetchScalarGridSpec + pl.Element row indexing instead of an XLA gather.
    r = jnp.arange(nt)
    top_idx = jnp.abs(r * TH - 1)                            # r == 0 -> row 1
    bot_idx = (Hp - 1) - jnp.abs(r * TH + TH - (Hp - 1))     # last r -> Hp-2
    halo = jnp.stack([img_p[:, top_idx, :], img_p[:, bot_idx, :]], axis=2)

    kernel = functools.partial(
        _perona_malik_kernel,
        w=W,
        th=TH,
        inv_dr2=1.0 / float(diffusion_rate) ** 2,
        delta_t=float(delta_t),
    )

    out = pl.pallas_call(
        kernel,
        out_shape=jax.ShapeDtypeStruct((N, Hp, Wp), dtype),
        grid=(N, nt),                       # nt innermost: contiguous rows
        in_specs=[
            pl.BlockSpec((1, 1, 2, Wp), lambda n, t: (n, t, 0, 0)),
            pl.BlockSpec((1, TH, Wp), lambda n, t: (n, t, 0)),
        ],
        out_specs=pl.BlockSpec((1, TH, Wp), lambda n, t: (n, t, 0)),
        compiler_params=pltpu.CompilerParams(
            dimension_semantics=("parallel", "parallel"),
            vmem_limit_bytes=48 << 20),
    )(halo, img_p)

    out = out[:, :H, :W]
    return out.reshape(N, 1, H, W)


def _reference(image, laplace, diffusion_rate, delta_t):
    """Pure-JAX reference (full 9-tap conv, mirrors the PyTorch module)."""
    img2d = image[:, 0]
    N, H, W = img2d.shape
    padded = jnp.pad(img2d, ((0, 0), (1, 1), (1, 1)), mode="reflect")
    grad = jnp.zeros_like(img2d)
    for dy in range(3):
        for dx in range(3):
            grad = grad + laplace[dy, dx] * padded[:, dy:dy + H, dx:dx + W]
    coeff = jnp.exp(-(grad ** 2) / (diffusion_rate ** 2))
    out = jnp.clip(img2d + grad * coeff * delta_t, 0.0, 1.0)
    return out[:, None]


if __name__ == "__main__":
    key = jax.random.PRNGKey(0)
    N, C, H, W = 2, 1, 16, 16
    image = jax.random.uniform(key, (N, C, H, W), dtype=jnp.float32)

    # Standard 4-neighbor Laplacian = make_operator('laplace'); non-learnable
    # in the default config, so the kernel bakes these weights in.
    laplace = jnp.array([[0.0, 1.0, 0.0],
                         [1.0, -4.0, 1.0],
                         [0.0, 1.0, 0.0]], dtype=jnp.float32)

    diffusion_rate = 0.25
    delta_t = 0.1

    ref = _reference(image, laplace, diffusion_rate, delta_t)

    # Explicit two-tile path -- exercises the halo / tile-boundary logic.
    out_tiled = perona_malik_forward(image, diffusion_rate, delta_t, row_tile=8)
    out_tiled = jax.block_until_ready(out_tiled)
    assert out_tiled.shape == (N, C, H, W)
    assert jnp.max(jnp.abs(out_tiled - ref)) < 1e-5

    # Auto-picked tile.
    out_auto = perona_malik_forward(image, diffusion_rate, delta_t)
    out_auto = jax.block_until_ready(out_auto)
    assert jnp.max(jnp.abs(out_auto - ref)) < 1e-5

    # Non-aligned H/W -- exercises the pad-to-(8,128) + slice-back path.
    image_odd = jax.random.uniform(jax.random.PRNGKey(1), (1, 1, 13, 20),
                                   dtype=jnp.float32)
    ref_odd = _reference(image_odd, laplace, diffusion_rate, delta_t)
    out_odd = jax.block_until_ready(
        perona_malik_forward(image_odd, diffusion_rate, delta_t))
    assert jnp.max(jnp.abs(out_odd - ref_odd)) < 1e-5

    # TODO(synk): 'inv' coefficient path (scharr_x/scharr_y gradient magnitude),
    # the learned-conv fallback (coefficient is None), and a learnable laplace
    # operator (general 9-tap weights) are not in the default config and are
    # not implemented here.
    print("KERNEL_OK")
</pallas_src>

<mosaic_0001>
module attributes {stable_mosaic.version = 11 : i64} {
  func.func @_perona_malik_kernel(%arg0: i32, %arg1: i32, %arg2: memref<1x1x2x128xf32, #tpu.memory_space<vmem>>, %arg3: memref<1x8x128xf32, #tpu.memory_space<vmem>>, %arg4: memref<1x8x128xf32, #tpu.memory_space<vmem>>) attributes {dimension_semantics = [#tpu.dimension_semantics<parallel>, #tpu.dimension_semantics<parallel>], iteration_bounds = array<i64: 2, 2>, scalar_prefetch = 0 : i64, scratch_operands = 0 : i64, tpu.core_type = #tpu.core_type<tc>, window_params = [{transform_indices = @transform_0, window_bounds = array<i64: 1, 1, 2, 128>}, {transform_indices = @transform_1, window_bounds = array<i64: 1, 8, 128>}, {transform_indices = @transform_2, window_bounds = array<i64: 1, 8, 128>}]} {
    %c0 = arith.constant 0 : index
    %c0_0 = arith.constant 0 : index
    %c0_1 = arith.constant 0 : index
    %0 = vector.load %arg3[%c0, %c0_0, %c0_1] : memref<1x8x128xf32, #tpu.memory_space<vmem>>, vector<1x8x128xf32>
    %1 = vector.shape_cast %0 : vector<1x8x128xf32> to vector<8x128xf32>
    %c0_2 = arith.constant 0 : index
    %c0_3 = arith.constant 0 : index
    %c0_4 = arith.constant 0 : index
    %c0_5 = arith.constant 0 : index
    %2 = vector.load %arg2[%c0_2, %c0_3, %c0_4, %c0_5] : memref<1x1x2x128xf32, #tpu.memory_space<vmem>>, vector<1x1x2x128xf32>
    %3 = vector.shape_cast %2 : vector<1x1x2x128xf32> to vector<2x128xf32>
    %4 = vector.extract_strided_slice %3 {offsets = [0, 0], sizes = [1, 128], strides = [1, 1]} : vector<2x128xf32> to vector<1x128xf32>
    %5 = vector.extract_strided_slice %3 {offsets = [1, 0], sizes = [1, 128], strides = [1, 1]} : vector<2x128xf32> to vector<1x128xf32>
    %6 = tpu.iota {dimensions = array<i32: 0>} : vector<8x128xi32>
    %7 = tpu.iota {dimensions = array<i32: 1>} : vector<8x128xi32>
    %c1_i32 = arith.constant 1 : i32
    %8 = tpu.dynamic_rotate %1 by %c1_i32 dim 0 : vector<8x128xf32>, i32 -> vector<8x128xf32>
    %c7_i32 = arith.constant 7 : i32
    %9 = tpu.dynamic_rotate %1 by %c7_i32 dim 0 : vector<8x128xf32>, i32 -> vector<8x128xf32>
    %10 = arith.addf %8, %9 : vector<8x128xf32>
    %c0_i32 = arith.constant 0 : i32
    %11 = vector.broadcast %c0_i32 : i32 to vector<8x128xi32>
    %12 = arith.cmpi eq, %6, %11 : vector<8x128xi32>
    %13 = vector.extract_strided_slice %1 {offsets = [1, 0], sizes = [1, 128], strides = [1, 1]} : vector<8x128xf32> to vector<1x128xf32>
    %14 = arith.addf %4, %13 : vector<1x128xf32>
    %15 = vector.shape_cast %14 : vector<1x128xf32> to vector<1x128xf32>
    %16 = vector.broadcast %15 : vector<1x128xf32> to vector<8x128xf32>
    %17 = arith.select %12, %16, %10 : vector<8x128xi1>, vector<8x128xf32>
    %c7_i32_6 = arith.constant 7 : i32
    %18 = vector.broadcast %c7_i32_6 : i32 to vector<8x128xi32>
    %19 = arith.cmpi eq, %6, %18 : vector<8x128xi32>
    %20 = vector.extract_strided_slice %1 {offsets = [6, 0], sizes = [1, 128], strides = [1, 1]} : vector<8x128xf32> to vector<1x128xf32>
    %21 = arith.addf %5, %20 : vector<1x128xf32>
    %22 = vector.shape_cast %21 : vector<1x128xf32> to vector<1x128xf32>
    %23 = vector.broadcast %22 : vector<1x128xf32> to vector<8x128xf32>
    %24 = arith.select %19, %23, %17 : vector<8x128xi1>, vector<8x128xf32>
    %c1_i32_7 = arith.constant 1 : i32
    %25 = tpu.dynamic_rotate %1 by %c1_i32_7 dim 1 : vector<8x128xf32>, i32 -> vector<8x128xf32>
    %c127_i32 = arith.constant 127 : i32
    %26 = tpu.dynamic_rotate %1 by %c127_i32 dim 1 : vector<8x128xf32>, i32 -> vector<8x128xf32>
    %27 = arith.addf %25, %26 : vector<8x128xf32>
    %c0_i32_8 = arith.constant 0 : i32
    %28 = vector.broadcast %c0_i32_8 : i32 to vector<8x128xi32>
    %29 = arith.cmpi eq, %7, %28 : vector<8x128xi32>
    %30 = vector.extract_strided_slice %1 {offsets = [0, 1], sizes = [8, 1], strides = [1, 1]} : vector<8x128xf32> to vector<8x1xf32>
    %cst = arith.constant 2.000000e+00 : f32
    %31 = vector.broadcast %cst : f32 to vector<8x1xf32>
    %32 = arith.mulf %31, %30 : vector<8x1xf32>
    %33 = vector.shape_cast %32 : vector<8x1xf32> to vector<8x1xf32>
    %34 = vector.broadcast %33 : vector<8x1xf32> to vector<8x128xf32>
    %35 = arith.select %29, %34, %27 : vector<8x128xi1>, vector<8x128xf32>
    %c15_i32 = arith.constant 15 : i32
    %36 = vector.broadcast %c15_i32 : i32 to vector<8x128xi32>
    %37 = arith.cmpi eq, %7, %36 : vector<8x128xi32>
    %38 = vector.extract_strided_slice %1 {offsets = [0, 14], sizes = [8, 1], strides = [1, 1]} : vector<8x128xf32> to vector<8x1xf32>
    %cst_9 = arith.constant 2.000000e+00 : f32
    %39 = vector.broadcast %cst_9 : f32 to vector<8x1xf32>
    %40 = arith.mulf %39, %38 : vector<8x1xf32>
    %41 = vector.shape_cast %40 : vector<8x1xf32> to vector<8x1xf32>
    %42 = vector.broadcast %41 : vector<8x1xf32> to vector<8x128xf32>
    %43 = arith.select %37, %42, %35 : vector<8x128xi1>, vector<8x128xf32>
    %44 = arith.addf %24, %43 : vector<8x128xf32>
    %cst_10 = arith.constant 4.000000e+00 : f32
    %45 = vector.broadcast %cst_10 : f32 to vector<8x128xf32>
    %46 = arith.mulf %45, %1 : vector<8x128xf32>
    %47 = arith.subf %44, %46 : vector<8x128xf32>
    %48 = arith.mulf %47, %47 : vector<8x128xf32>
    %cst_11 = arith.constant 0.000000e+00 : f32
    %49 = vector.broadcast %cst_11 : f32 to vector<8x128xf32>
    %50 = arith.subf %49, %48 : vector<8x128xf32>
    %cst_12 = arith.constant 1.600000e+01 : f32
    %51 = vector.broadcast %cst_12 : f32 to vector<8x128xf32>
    %52 = arith.mulf %50, %51 : vector<8x128xf32>
    %53 = math.exp %52 : vector<8x128xf32>
    %54 = arith.mulf %47, %53 : vector<8x128xf32>
    %cst_13 = arith.constant 1.000000e-01 : f32
    %55 = vector.broadcast %cst_13 : f32 to vector<8x128xf32>
    %56 = arith.mulf %54, %55 : vector<8x128xf32>
    %57 = arith.addf %1, %56 : vector<8x128xf32>
    %cst_14 = arith.constant 0.000000e+00 : f32
    %cst_15 = arith.constant 1.000000e+00 : f32
    %58 = vector.broadcast %cst_14 : f32 to vector<8x128xf32>
    %59 = arith.maximumf %58, %57 : vector<8x128xf32>
    %60 = vector.broadcast %cst_15 : f32 to vector<8x128xf32>
    %61 = arith.minimumf %60, %59 : vector<8x128xf32>
    %c0_16 = arith.constant 0 : index
    %c0_17 = arith.constant 0 : index
    %c0_18 = arith.constant 0 : index
    %62 = vector.load %arg4[%c0_16, %c0_17, %c0_18] : memref<1x8x128xf32, #tpu.memory_space<vmem>>, vector<1x8x128xf32>
    %63 = vector.shape_cast %62 : vector<1x8x128xf32> to vector<8x128xf32>
    %64 = vector.shape_cast %61 : vector<8x128xf32> to vector<1x8x128xf32>
    tpu.vector_store %arg4[%c0_16, %c0_17, %c0_18], %64 {strides = array<i32>} : memref<1x8x128xf32, #tpu.memory_space<vmem>>, vector<1x8x128xf32>,
    return
  }
  func.func @transform_0(%arg0: i32, %arg1: i32) -> (i32, i32, i32, i32) {
    %c0_i32 = arith.constant 0 : i32
    %c0_i32_0 = arith.constant 0 : i32
    %c0_i32_1 = arith.constant 0 : i32
    return %arg0, %arg1, %c0_i32, %c0_i32_0 : i32, i32, i32, i32
  }
  func.func @transform_1(%arg0: i32, %arg1: i32) -> (i32, i32, i32) {
    %c0_i32 = arith.constant 0 : i32
    %c0_i32_0 = arith.constant 0 : i32
    return %arg0, %arg1, %c0_i32 : i32, i32, i32
  }
  func.func @transform_2(%arg0: i32, %arg1: i32) -> (i32, i32, i32) {
    %c0_i32 = arith.constant 0 : i32
    %c0_i32_0 = arith.constant 0 : i32
    return %arg0, %arg1, %c0_i32 : i32, i32, i32
  }
}

</mosaic_0001>

<bundles_post_ra>
// kernel: tpu_custom_call.1
= control target key start
LH: loop header
LB: loop body
LE: loop exit
PB: predicated region body
PF: predicated region fallthrough
CT: control target
= control target key end

     0   :  { %7 = vsyncpa [#allocation3], 0  ;;  %s945_s0 = inlined_call_operand.hbm [shape: f32[2,2,2,128], index: 0, kind: input, shape index: {}]   ;;  %s946_s1 = inlined_call_operand.hbm [shape: f32[2,16,128], index: 1, kind: input, shape index: {}]   ;;  %s947_s2 = inlined_call_operand.hbm [shape: f32[2,16,128], index: 2, kind: output, shape index: {}]  }
   0x1   :  { %9 = vsyncpa [#allocation3 + $0x1], 0 }
   0x2   :  { %10 = vsyncpa [#allocation6], 0 }
   0x3   :  { %12 = vsyncpa [#allocation6 + $0x1], 0 }
   0x4   :  { %13 = vsyncpa [#allocation4], 0 }
   0x5   :  { %15 = vsyncpa [#allocation4 + $0x1], 0  ;;  %s701_s9 = smov 0   ;;  %s703_s10 = smov 0  }
   0x6   :  { %s705_s11 = smov 0   ;;  %s707_s12 = smov 0  }
   0x7   :  { %s709_s13 = smov 0   ;;  %s711_s14 = smov 0  }
   0x8   :  { %s713_s15 = smov 0   ;;  %s715_s16 = smov 0  }
   0x9 LB: > { %s405_s17 = sadd.s32 4294967295, %s677_s16   ;;  %s406_s18 = sadd.s32 4294967294, %s677_s16   ;;  %s677_s16 = sphi %s715_s16, %s21_s16   ;;  %s673_s15 = sphi %s713_s15, %s968_s15   ;;  %s669_s14 = sphi %s711_s14, %s967_s14   ;;  %s665_s13 = sphi %s709_s13, %s966_s13   ;;  %s661_s12 = sphi %s707_s12, %s965_s12   ;;  %s657_s11 = sphi %s705_s11, %s964_s11   ;;  %s653_s10 = sphi %s703_s10, %s963_s10   ;;  %s649_s9 = sphi %s701_s9, %s962_s9  }
   0xa   : > { %s30_s19 = sadd.s32 1, %s669_s14  ;;  %s33_s20 = sadd.s32 1, %s673_s15 }
   0xb   : > { %p31_p0 = scmp.ge.s32.totalorder %s30_s19, 2  ;;  %s42_s21 = sadd.s32 1, %s657_s11 }
   0xc   : > { %p49_p1 = scmp.ne.s32.totalorder %s657_s11, %s653_s10  ;;  %p50_p2 = scmp.eq.s32.totalorder %s677_s16, 0 }
   0xd   : > { %s970_s19 = smov (%p31_p0, %s30_s19), 0  ;;  %s972_s20 = smov (!%p31_p0, %s33_s20), %s673_s15 }
   0xe   : > { %s38_s22 = ssub.s32 %s669_s14, %s970_s19  ;;  %p754_p3 = por %p50_p2, %p49_p1 }
   0xf   : > { %p35_p4 = scmp.ge.s32.totalorder %s972_s20, 2  ;;  %p55_p5 = scmp.ne.s32.totalorder %s653_s10, %s649_s9 }
  0x10   : > { %p56_p6 = scmp.eq.s32.totalorder %s405_s17, 0  ;;  %p109_p7 = scmp.eq.s32.totalorder %s405_s17, 3 }
  0x11   : > { %s974_s20 = smov (%p35_p4, %s972_s20), 0  ;;  %p115_p10 = scmp.eq.s32.totalorder %s406_s18, 3 }
  0x12   : > { %p762_p8 = por %p56_p6, %p55_p5  ;;  %p766_p9 = por %p109_p7, %p49_p1 }
  0x13   : > { %s37_s26 = ssub.s32 %s673_s15, %s974_s20  ;;  %p772_p12 = por %p115_p10, %p55_p5 }
  0x14   : > { %s951_s24 = scalar_select %p762_p8, 1, 0 }
  0x15   : > { %s952_s25 = scalar_select %p766_p9, 1, 0 }
  0x16   : > { %s39_s27 = sor.u32 %s38_s22, %s37_s26  ;;  %p441_p13 = scmp.lt.s32.totalorder %s677_s16, 4 }
  0x17   : > { %p40_p11 = scmp.eq.s32.totalorder %s39_s27, 0  ;;  %s778_s29 = sand.u32 1, %s657_s11  }
  0x18   : > { %s953_s28 = scalar_select %p772_p12, 1, 0 }
  0x19   : > { %s781_s30 = scalar_select %p40_p11, %s657_s11, %s42_s21  }
  0x1a   : > { %s409_s3 = sshll.u32 %s778_s29, 1  ;;  %s410_s4 = sshll.u32 %s673_s15, 1 }
  0x1b   : > { %s786_s5 = sadd.s32 %s669_s14, %s410_s4  ;;  %s139_s6 = scalar_lea.vmem [#allocation2], %s409_s3 }
  0x1c   : > { %s148_s7 = sshll.u32 %s139_s6, 4  ;;  %s411_s8 = sshll.u32 %s786_s5, 5  ;;  %s789_s7 = int_to_ptr.vmem [resolvable:$true] %s148_s7 }
  0x1d   : > { %s794_s22 = scalar_lea.hbm %s945_s0, %s411_s8  ;;  %p798_p0 = pnand %p441_p13, %p754_p3 }
  0x1e   : > { %s136_s26 = scalar_lea.sflag [#allocation3], %s778_s29  ;;  %s515_s27 = scalar_lea.hbm %s794_s22, 32 }
  0x1f   : > { %p516_p4 = scmp.ne.s32.totalorder %s794_s22, %s515_s27  ;;  %p517_p5 = pneg %p798_p0 }
  0x20   : > { %s520_s4 = scalar_lea.hbm %s945_s0, 128  ;;  %p521_p3 = scmp.lt.u32.totalorder %s794_s22, %s945_s0 }
  0x21   : > { %p518_p6 = pnand %p517_p5, %p516_p4  ;;  %p522_p10 = scmp.lt.u32.totalorder %s520_s4, %s515_s27 }
  0x22   : > { %p524_p13 = scmp.lt.u32.totalorder %s515_s27, %s794_s22 }
  0x23   : > { %p519_p7 = pneg %p518_p6  ;;  %p523_p11 = por %p522_p10, %p521_p3 }
  0x25   : > { %p525_p1 = por %p524_p13, %p523_p11 }
  0x27   : > { %p526_p2 = pnand %p525_p1, %p519_p7 }
  0x29   : > { %529 = shalt.err (!%p526_p2)
}
  0x2a   : > { %s530_s17 = scalar_lea.vmem %s789_s7, 32  ;;  %s679_s18 = smov [#allocation2]  }
  0x2b   : > { %p531_p4 = scmp.ne.s32.totalorder %s789_s7, %s530_s17  ;;  %s535_s23 = sshll.u32 %s679_s18, 4  ;;  %s536_s23 = int_to_ptr.vmem [resolvable:$false] %s535_s23 }
  0x2c   : > { %s537_s3 = scalar_lea.vmem %s536_s23, 64  ;;  %p538_p9 = scmp.lt.s32.totalorder %s789_s7, %s536_s23 }
  0x2d   : > { %p533_p6 = pnand %p531_p4, %p517_p5  ;;  %p539_p3 = scmp.lt.s32.totalorder %s537_s3, %s530_s17 }
  0x2f   : > { %p534_p12 = pneg %p533_p6  ;;  %p540_p10 = por %p539_p3, %p538_p9 }
  0x31   : > { %p541_p11 = pnand %p540_p10, %p534_p12 }
  0x33   : > { %544 = shalt.err (!%p541_p11)
}
  0x34   : > { %433 = dma.hbm_to_vmem [thread:$0]  (!%p798_p0), %s794_s22, 32, %s789_s7, %s136_s26  }
  0x35   : > { %p955_p1 = scmp.lt.s32.totalorder %s677_s16, 5  ;;  %p956_p2 = scmp.ge.s32.totalorder %s677_s16, 1 }
  0x36   : > { %s412_s4 = sshll.u32 %s778_s29, 3  ;;  %s414_s6 = sshll.u32 %s786_s5, 7 }
  0x37   : > { %p834_p7 = pnand %p956_p2, %p955_p1  ;;  %s843_s18 = scalar_lea.hbm %s946_s1, %s414_s6 }
  0x38   : > { %s159_s23 = scalar_lea.vmem [#allocation5], %s412_s4  ;;  %s156_s7 = scalar_lea.sflag [#allocation6], %s778_s29 }
  0x39   : > { %s957_s27 = scalar_select %p834_p7, 1, 0 }
  0x3a   : > { %s168_s3 = sshll.u32 %s159_s23, 4  ;;  %s545_s22 = scalar_lea.hbm %s843_s18, 128  ;;  %s169_s3 = int_to_ptr.vmem [resolvable:$true] %s168_s3 }
  0x3b   : > { %p546_p9 = scmp.ne.s32.totalorder %s843_s18, %s545_s22  ;;  %s550_s8 = scalar_lea.hbm %s946_s1, 512 }
  0x3c   : > { %p551_p4 = scmp.lt.u32.totalorder %s843_s18, %s946_s1  ;;  %p552_p6 = scmp.lt.u32.totalorder %s550_s8, %s545_s22 }
  0x3d   : > { %p548_p12 = pnand %p546_p9, %p517_p5  ;;  %p554_p10 = scmp.lt.u32.totalorder %s545_s22, %s843_s18 }
  0x3e   : > { %p553_p3 = por %p552_p6, %p551_p4 }
  0x3f   : > { %p549_p13 = pneg %p548_p12 }
  0x40   : > { %p555_p11 = por %p554_p10, %p553_p3 }
  0x42   : > { %p556_p1 = pnand %p555_p11, %p549_p13 }
  0x44   : > { %559 = shalt.err (!%p556_p1)
}
  0x45   : > { %s560_s29 = scalar_lea.vmem %s169_s3, 128  ;;  %s680_s4 = smov [#allocation5]  }
  0x46   : > { %p561_p2 = scmp.ne.s32.totalorder %s169_s3, %s560_s29  ;;  %s565_s23 = sshll.u32 %s680_s4, 4  ;;  %s566_s23 = int_to_ptr.vmem [resolvable:$false] %s565_s23 }
  0x47   : > { %s567_s5 = scalar_lea.vmem %s566_s23, 256  ;;  %p568_p8 = scmp.lt.s32.totalorder %s169_s3, %s566_s23 }
  0x48   : > { %p563_p9 = pnand %p561_p2, %p517_p5  ;;  %p569_p7 = scmp.lt.s32.totalorder %s567_s5, %s560_s29 }
  0x4a   : > { %p564_p12 = pneg %p563_p9  ;;  %p570_p4 = por %p569_p7, %p568_p8 }
  0x4c   : > { %p571_p6 = pnand %p570_p4, %p564_p12 }
  0x4e   : > { %574 = shalt.err (!%p571_p6)
}
  0x4f   : > { %436 = dma.hbm_to_vmem [thread:$0]  (!%p798_p0), %s843_s18, 128, %s169_s3, %s156_s7  }
  0x50   : > { %p958_p13 = scmp.ne.s32.totalorder %s957_s27, 0 }
  0x51   : > { %s868_s22 = sand.u32 (!%p958_p13), 1, %s653_s10   ;;  %p959_p5 = scmp.ne.s32.totalorder (!%p958_p13), %s951_s24, 0 }
  0x52   : > { %177 = sbr.rel (%p958_p13) target bundleno = 277 (0x115), region = 28  ;;  %s416_s26 = sshll.u32 (!%p958_p13), %s868_s22, 1 }
  0x53   : > { %s180_s8 = scalar_lea.sflag (!%p958_p13), [#allocation3], %s868_s22  ;;  %s183_s6 = scalar_lea.vmem (!%p958_p13), [#allocation2], %s416_s26 }
  0x59   : > { %636 = dma.done.wait (%p959_p5), %s180_s8, 32  }
  0x5a   : > { %638 = vsyncadd (%p959_p5), %s180_s8, 4294967264  ;;  %s417_s21 = sshll.u32 %s868_s22, 3  ;;  %s189_s27 = scalar_lea.sflag [#allocation6], %s868_s22 }
  0x5b   : > { %s192_s18 = scalar_lea.vmem [#allocation5], %s417_s21 }
  0x5c   : > { %640 = dma.done.wait (%p959_p5), %s189_s27, 128  }
  0x5d   : > { %642 = vsyncadd (%p959_p5), %s189_s27, 4294967168  ;;  %v681_v0 = vmov 1   ;;  %v218_v1 = vld [vmem:[%s192_s18] sm:$0xff]  ;;  %s682_s3 = smov 1   ;;  %s683_s7 = smov 127   ;;  %v684_v3 = vmov 14   ;;  %v220_v4 = vlaneseq }
  0x5e   : > { %511 = vset.pattern.permute.xlu0 %v681_v0  ;;  %v252_v2 = vmul.f32 2.0, %v218_v1  ;;  %246 = vrot.lane.b32.xlu1 %v218_v1, %s682_s3  ;;  %v225_v6 = vrot.slane %v218_v1, 1  ;;  %v219_v7 = vld [vmem:[%s183_s6] sm:$0x3]  ;;  %v238_v9 = vrot.slane %v218_v1, 5  ;;  %v224_v11 = vrot.slane %v218_v1, 7 }
  0x5f   : > { %v221_v5 = vshrl.u32 %v220_v4, 7  ;;  %v223_v18 = vand.u32 127, %v220_v4  ;;  %v266_v25 = vmul.f32 4.0, %v218_v1  ;;  %s420_s24 = sshll.u32 %s665_s13, 1  ;;  %s217_s4 = scalar_lea.vmem [#allocation7], %s417_s21 }
  0x60   : > { %255 = vperm.xlu0 %511, %v252_v2   ;;  %v231_v12 = vadd.f32 %v225_v6, %v219_v7  ;;  %v240_v14 = vadd.f32 %v238_v9, %v219_v7  ;;  %v226_v15 = vadd.f32 %v225_v6, %v224_v11  ;;  %s291_s17 = sadd.s32 %s661_s12, %s420_s24  ;;  %s295_s23 = sshll.u32 %s217_s4, 4  ;;  %s893_s23 = int_to_ptr.vmem [resolvable:$true] %s295_s23 }
  0x61   : > { %v234_v10 = vsub.s32 0, %v221_v5  ;;  %v243_v13 = vsub.s32 1, %v221_v5  ;;  %vm227_vm0 = vcmp.eq.s32.totalorder %v221_v5, 0  ;;  %vm237_vm1 = vcmp.eq.s32.totalorder %v221_v5, 7  ;;  %s421_s29 = sshll.u32 %s291_s17, 7  ;;  %s280_s13 = scalar_lea.sflag [#allocation4], %s868_s22 }
  0x62   : > { %248 = vrot.lane.b32.xlu1 %v218_v1, %s683_s7  ;;  %vm251_vm2 = vcmp.eq.s32.totalorder %v223_v18, 0  ;;  %vm259_vm3 = vcmp.eq.s32.totalorder %v223_v18, 15  ;;  %s891_s8 = scalar_lea.hbm %s947_s2, %s421_s29  ;;  %s575_s12 = scalar_lea.vmem %s893_s23, 128 }
  0x63   : > { %v235_v16 = vrot.slane %v231_v12, %v234_v10  ;;  %v244_v20 = vrot.slane %v240_v14, %v243_v13  ;;  %p576_p8 = scmp.ne.s32.totalorder %s893_s23, %s575_s12  ;;  %p960_p0 = scmp.ne.s32.totalorder %s952_s25, 0 }
  0x64   : > { %512 = vset.pattern.permute.xlu0 %v684_v3  ;;  %s685_s6 = smov [#allocation7]  }
  0x65   : > { %261 = vperm.xlu0 %512, %v252_v2   ;;  %v236_v22 = vsel %vm227_vm0, %v235_v16, %v226_v15  ;;  %p577_p7 = pnand %p576_p8, %p960_p0  ;;  %s579_s21 = sshll.u32 %s685_s6, 4  ;;  %s580_s21 = int_to_ptr.vmem [resolvable:$false] %s579_s21 }
  0x66   : > { %v245_v23 = vsel %vm237_vm1, %v244_v20, %v236_v22  ;;  %s581_s27 = scalar_lea.vmem %s580_s21, 256  ;;  %p582_p10 = scmp.lt.s32.totalorder %s893_s23, %s580_s21 }
  0x67   : > { %p578_p3 = pneg %p577_p7  ;;  %p583_p11 = scmp.lt.s32.totalorder %s581_s27, %s575_s12 }
  0x69   : > { %p584_p1 = por %p583_p11, %p582_p10 }
  0x6b   : > { %p585_p2 = pnand %p584_p1, %p578_p3 }
  0xd0   : > { %v247_v8 = vpop.permute.xlu1 %246 }
  0xd4   : > { %v249_v17 = vpop.permute.xlu1 %248 }
  0xd5   : > { %v250_v21 = vadd.f32 %v249_v17, %v247_v8 }
  0xdf   : > { %v256_v19 = vpop.permute.xlu0 %255 }
  0xe0   : > { %v258_v24 = vsel %vm251_vm2, %v256_v19, %v250_v21 }
  0xe4   : > { %v262_v26 = vpop.permute.xlu0 %261 }
  0xe5   : > { %v264_v27 = vsel %vm259_vm3, %v262_v26, %v258_v24 }
  0xe6   : > { %v265_v28 = vadd.f32 %v264_v27, %v245_v23 }
  0xe8   : > { %v267_v29 = vsub.f32 %v265_v28, %v266_v25 }
  0xea   : > { %v268_v30 = vmul.f32 %v267_v29, %v267_v29 }
  0xec   : > { %v269_v31 = vsub.f32 0.0, %v268_v30 }
  0xee   : > { %v270_v32 = vmul.f32 16.0, %v269_v31 }
  0xf0   : > { %v271_v33 = vmul.f32 1.442695, %v270_v32 }
  0xf2   : > { %513 = vpow2.f32 %v271_v33 }
  0xfc   : > { %v514_v34 = vpop.eup %513 }
  0xfd   : > { %v273_v35 = vmul.f32 %v514_v34, %v267_v29 }
  0xff   : > { %v274_v36 = vmul.f32 0.1, %v273_v35 }
 0x101   : > { %v275_v37 = vadd.f32 %v274_v36, %v218_v1 }
 0x103   : > { %v276_v38 = vmax.f32 %v275_v37, 0.0 }
 0x105   : > { %v277_v39 = vmin.f32 %v276_v38, 1.0 }
 0x107   : > { %278 = vst [vmem:[%s217_s4] sm:$0xff] %v277_v39 }
 0x108   : > { %588 = shalt.err (!%p585_p2)
}
 0x109   : > { %s589_s22 = scalar_lea.hbm %s891_s8, 128  ;;  %s593_s7 = scalar_lea.hbm %s947_s2, 512 }
 0x10a   : > { %p590_p9 = scmp.ne.s32.totalorder %s891_s8, %s589_s22  ;;  %p594_p6 = scmp.lt.u32.totalorder %s891_s8, %s947_s2 }
 0x10b   : > { %p595_p13 = scmp.lt.u32.totalorder %s593_s7, %s589_s22  ;;  %p597_p8 = scmp.lt.u32.totalorder %s589_s22, %s891_s8 }
 0x10c   : > { %p591_p12 = pnand %p590_p9, %p960_p0 }
 0x10d   : > { %p596_p5 = por %p595_p13, %p594_p6 }
 0x10e   : > { %p592_p4 = pneg %p591_p12 }
 0x10f   : > { %p598_p7 = por %p597_p8, %p596_p5 }
 0x111   : > { %p599_p3 = pnand %p598_p7, %p592_p4 }
 0x113   : > { %602 = shalt.err (!%p599_p3)
}
 0x114   : > { %428 = dma.vmem_to_hbm [thread:$0]  (%p960_p0), %s893_s23, 128, %s891_s8, %s280_s13  }
 0x115 PF: > { %p442_p10 = scmp.ge.s32.totalorder %s677_s16, 2  ;;  %s307_s29 = sand.u32 1, %s649_s9  }
 0x116   : > { %p961_p11 = scmp.ne.s32.totalorder %s953_s28, 0  ;;  %s308_s4 = scalar_lea.sflag [#allocation4], %s307_s29 }
 0x118   : > { %p438_p1 = pnand %p442_p10, %p961_p11 }
 0x11a   : > { %644 = dma.done.wait (!%p438_p1), %s308_s4, 128  }
 0x11b   : > { %646 = vsyncadd (!%p438_p1), %s308_s4, 4294967168  ;;  %s21_s16 = sadd.s32 1, %s677_s16   ;;  %s962_s9 = smov %s653_s10 }
 0x11c   : > { %p18_p2 = scmp.ge.s32.totalorder %s21_s16, 6   ;;  %s963_s10 = smov %s657_s11 }
 0x11d   : > { %s964_s11 = smov %s781_s30  ;;  %s965_s12 = smov %s669_s14 }
 0x11e   : > { %s966_s13 = smov %s673_s15  ;;  %s967_s14 = smov %s970_s19 }
 0x11f   : > { %s968_s15 = smov %s974_s20  ;;  %20 = sbr.rel (!%p18_p2) target bundleno = 9 (0x9), region = 86 }
 0x126   :  { %313 = vsyncpa [#allocation3], 1 }
 0x127   :  { %315 = vsyncpa [#allocation3 + $0x1], 1 }
 0x128   :  { %316 = vsyncpa [#allocation6], 1 }
 0x129   :  { %318 = vsyncpa [#allocation6 + $0x1], 1 }
 0x12a   :  { %319 = vsyncpa [#allocation4], 1 }
 0x12b   :  { %321 = vsyncpa [#allocation4 + $0x1], 1 }

</bundles_post_ra>
